<compile_context>
chip_gen: v7x
topology: tpu7x:2x2x1
jax: 0.10.0
libtpu: 0.0.40
codegen_flags: <defaults>
</compile_context>

<pallas_src>
import functools

import jax
import jax.numpy as jnp
from jax.experimental import pallas as pl
from jax.experimental.pallas import tpu as pltpu


# ----------------------------------------------------------------------------
# WSBNFull (training mode, batch statistics, biased variance)
# ----------------------------------------------------------------------------
def _wsbn_stats_kernel(x_ref, sum_ref, sq_ref):
    # x_ref: (TM, C) row-tile;  sum_ref / sq_ref: (1, C) resident accumulators.
    @pl.when(pl.program_id(0) == 0)
    def _():
        sum_ref[...] = jnp.zeros_like(sum_ref)
        sq_ref[...] = jnp.zeros_like(sq_ref)

    x = x_ref[...].astype(jnp.float32)
    sum_ref[...] += jnp.sum(x, axis=0, keepdims=True)
    sq_ref[...] += jnp.sum(x * x, axis=0, keepdims=True)


def _wsbn_norm_kernel(x_ref, scale_ref, shift_ref, o_ref):
    # y = x * scale + shift  (scale = gamma * rsqrt(var+eps), shift = beta - mean*scale)
    x = x_ref[...].astype(jnp.float32)
    o_ref[...] = (x * scale_ref[...] + shift_ref[...]).astype(o_ref.dtype)


def _pick_row_tile(m, target_rows):
    """Largest multiple-of-8 divisor of m that is <= target_rows (fallback: m itself)."""
    if m <= 8:
        return m
    t = min(m, max(8, (target_rows // 8) * 8))
    while t > 8 and m % t != 0:
        t -= 8
    return t if m % t == 0 else m


def wsbn_train(x_nhwc, gamma, beta, *, eps=1e-5, block_rows=256):
    """Training-mode batch norm over an NHWC tensor with per-channel gamma/beta."""
    N, H, W, C = x_nhwc.shape
    M = N * H * W
    x2 = x_nhwc.reshape(M, C)               # free collapse of leading dims (no HBM transpose)

    tm = _pick_row_tile(M, block_rows)
    grid = (M // tm,)
    tile_bytes = tm * C * x2.dtype.itemsize
    # Explicit VMEM budget (sized well under v7x's 64 MiB physical VMEM).
    vmem_limit = int(min(64 * 2**20, max(4 * 2**20, 8 * tile_bytes)))

    # Pass 1: per-channel sum and sum-of-squares (output block resident across the grid).
    ssum, ssq = pl.pallas_call(
        _wsbn_stats_kernel,
        out_shape=(jax.ShapeDtypeStruct((1, C), jnp.float32),
                   jax.ShapeDtypeStruct((1, C), jnp.float32)),
        grid=grid,
        in_specs=[pl.BlockSpec((tm, C), lambda i: (i, 0))],
        out_specs=(pl.BlockSpec((1, C), lambda i: (0, 0)),
                   pl.BlockSpec((1, C), lambda i: (0, 0))),
        compiler_params=pltpu.CompilerParams(
            dimension_semantics=("arbitrary",),
            vmem_limit_bytes=vmem_limit),
    )(x2)

    # Tiny C-length math (negligible): biased variance, fused scale/shift.
    mean = ssum / M
    var = jnp.maximum(ssq / M - mean * mean, 0.0)
    inv = jax.lax.rsqrt(var + eps)
    scale = (gamma.reshape(1, C).astype(jnp.float32) * inv)
    shift = (beta.reshape(1, C).astype(jnp.float32) - mean * scale)

    # Pass 2: normalize — fully parallel grid (megacore-shardable on v7x).
    # NOTE: output is lane-dense whenever C >= 128; for tiny C the store is masked (acceptable).
    y2 = pl.pallas_call(
        _wsbn_norm_kernel,
        out_shape=jax.ShapeDtypeStruct((M, C), x_nhwc.dtype),
        grid=grid,
        in_specs=[pl.BlockSpec((tm, C), lambda i: (i, 0)),
                  pl.BlockSpec((1, C), lambda i: (0, 0)),
                  pl.BlockSpec((1, C), lambda i: (0, 0))],
        out_specs=pl.BlockSpec((tm, C), lambda i: (i, 0)),
        compiler_params=pltpu.CompilerParams(
            dimension_semantics=("parallel",),
            vmem_limit_bytes=vmem_limit),
    )(x2, scale, shift)

    # TODO(synk): running_mean_{prev_id}/running_var_{prev_id} momentum updates (stateful buffers)
    #             are not replicated; only the training-mode forward output is produced.
    return y2.reshape(N, H, W, C)


# ----------------------------------------------------------------------------
# ReLU + Conv2d (bias=False), stride=1 — optional / dead in the module forward
# ----------------------------------------------------------------------------
def _relu_conv_kernel(xp_ref, w_ref, o_ref, acc_ref, *, KH, KW, H_out, W_out, dilation):
    # xp_ref: (1, Hp, Wp, C_in) zero-padded image; w_ref: (KH, KW, C_in, C_out)
    # acc_ref: VMEM scratch accumulator (1, H_out, W_out, C_out) f32.
    x = jnp.maximum(xp_ref[...].astype(jnp.float32), 0.0)   # ReLU in f32 (v5e VPU has no bf16)
    xb = x.astype(jnp.bfloat16)                              # bf16 operands -> 2x MXU throughput
    acc_ref[...] = jnp.zeros_like(acc_ref)
    # TODO(synk): fold the KH*KW taps into one im2col-style K=KH*KW*C_in contraction and tile
    #             H_out rows with an explicit halo for large images / channel counts.
    for kh in range(KH):
        for kw in range(KW):
            h0 = kh * dilation
            w0 = kw * dilation
            xs = xb[:, h0:h0 + H_out, w0:w0 + W_out, :]      # (1, H_out, W_out, C_in)
            w_tap = w_ref[kh, kw].astype(jnp.bfloat16)       # (C_in, C_out)
            acc_ref[...] += jax.lax.dot_general(
                xs, w_tap,
                dimension_numbers=(((3,), (0,)), ((), ())),
                preferred_element_type=jnp.float32)
    o_ref[...] = acc_ref[...].astype(o_ref.dtype)


def relu_conv(x_nhwc, conv_w_oihw, *, padding=1, dilation=1):
    # TODO(synk): stride=1 only; general stride needs strided output indexing.
    N, H, W, C_in = x_nhwc.shape
    C_out, C_in_w, KH, KW = conv_w_oihw.shape
    assert C_in_w == C_in
    H_out = H + 2 * padding - dilation * (KH - 1)
    W_out = W + 2 * padding - dilation * (KW - 1)
    Hp, Wp = H + 2 * padding, W + 2 * padding

    # TODO(synk): the explicit pad is one extra HBM pass; for large inputs handle the halo via the
    #             BlockSpec index_map + in-kernel boundary masking instead.
    x_pad = jnp.pad(x_nhwc, ((0, 0), (padding, padding), (padding, padding), (0, 0)))
    w_hwio = jnp.transpose(conv_w_oihw, (2, 3, 1, 0))        # tiny weight transpose (KH,KW,Ci,Co)

    kernel = functools.partial(_relu_conv_kernel, KH=KH, KW=KW,
                               H_out=H_out, W_out=W_out, dilation=dilation)
    tile_bytes = Hp * Wp * C_in * x_pad.dtype.itemsize
    vmem_limit = int(min(64 * 2**20, max(8 * 2**20, 8 * tile_bytes)))

    out = pl.pallas_call(
        kernel,
        out_shape=jax.ShapeDtypeStruct((N, H_out, W_out, C_out), x_nhwc.dtype),
        grid=(N,),                                            # pipelined + parallel over images
        in_specs=[
            pl.BlockSpec((1, Hp, Wp, C_in), lambda n: (n, 0, 0, 0)),
            pl.BlockSpec((KH, KW, C_in, C_out), lambda n: (0, 0, 0, 0)),
        ],
        out_specs=pl.BlockSpec((1, H_out, W_out, C_out), lambda n: (n, 0, 0, 0)),
        scratch_shapes=[pltpu.VMEM((1, H_out, W_out, C_out), jnp.float32)],
        compiler_params=pltpu.CompilerParams(
            dimension_semantics=("parallel",),
            vmem_limit_bytes=vmem_limit),
    )(x_pad, w_hwio)
    return out


# ----------------------------------------------------------------------------
# Module-equivalent forward
# ----------------------------------------------------------------------------
def relu_conv_wsbn_forward(x_nhwc, conv_w_oihw, wsbn_weight, wsbn_bias, prev_id, *,
                           padding=1, dilation=1, eps=1e-5,
                           compute_conv=False, block_rows=256):
    """Faithful forward: returns WSBN(x) (the conv result is discarded by the reference module).

    compute_conv=False (default) skips the dead ReLU+Conv entirely (largest single perf win);
    set it True only if the intermediate conv output is genuinely needed for inspection.
    """
    gamma = wsbn_weight[prev_id]
    beta = wsbn_bias[prev_id]
    bn_out = wsbn_train(x_nhwc, gamma, beta, eps=eps, block_rows=block_rows)

    conv_out = None
    if compute_conv:
        conv_out = relu_conv(x_nhwc, conv_w_oihw, padding=padding, dilation=dilation)
    return bn_out, conv_out


if __name__ == "__main__":
    key = jax.random.PRNGKey(0)
    N, H, W, C_in = 2, 16, 16, 8
    C_out = 8          # reference forward applies BN(C_out) to x => requires C_out == C_in
    KH = KW = 3
    num_possible_input = 4
    prev_id = 1

    k1, k2 = jax.random.split(key)
    x = jax.random.normal(k1, (N, H, W, C_in), jnp.float32)                   # NHWC activations
    conv_w = 0.1 * jax.random.normal(k2, (C_out, C_in, KH, KW), jnp.float32)  # OIHW (PyTorch)

    # WSBNFull.reset_parameters(): affine weight -> 1, bias -> 0.
    wsbn_weight = jnp.ones((num_possible_input, C_out), jnp.float32)
    wsbn_bias = jnp.zeros((num_possible_input, C_out), jnp.float32)

    # Module-equivalent forward (dead conv skipped by default).
    bn_out, conv_out = relu_conv_wsbn_forward(
        x, conv_w, wsbn_weight, wsbn_bias, prev_id, padding=1, dilation=1)
    jax.block_until_ready(bn_out)
    assert bn_out.shape == (N, H, W, C_in)
    assert conv_out is None

    # Exercise the optional ReLU+Conv kernel once as well.
    bn_out2, conv_out2 = relu_conv_wsbn_forward(
        x, conv_w, wsbn_weight, wsbn_bias, prev_id, padding=1, dilation=1, compute_conv=True)
    jax.block_until_ready((bn_out2, conv_out2))
    assert conv_out2.shape == (N, H, W, C_out)

    # Numeric sanity check of the WSBN output against pure JAX (gamma=1, beta=0).
    mean = jnp.mean(x, axis=(0, 1, 2), keepdims=True)
    var = jnp.mean((x - mean) ** 2, axis=(0, 1, 2), keepdims=True)
    ref = (x - mean) * jax.lax.rsqrt(var + 1e-5)
    assert jnp.allclose(bn_out, ref, atol=1e-3, rtol=1e-3)

    print("KERNEL_OK")
</pallas_src>

<mosaic_0001>
module attributes {stable_mosaic.version = 11 : i64} {
  func.func @_wsbn_stats_kernel(%arg0: i32, %arg1: memref<256x8xf32, #tpu.memory_space<vmem>>, %arg2: memref<1x8xf32, #tpu.memory_space<vmem>>, %arg3: memref<1x8xf32, #tpu.memory_space<vmem>>) attributes {dimension_semantics = [#tpu.dimension_semantics<arbitrary>], iteration_bounds = array<i64: 2>, scalar_prefetch = 0 : i64, scratch_operands = 0 : i64, tpu.core_type = #tpu.core_type<tc>, window_params = [{transform_indices = @transform_0, window_bounds = array<i64: 256, 8>}, {pipeline_mode = #tpu.pipeline_mode<synchronous>, transform_indices = @transform_1, window_bounds = array<i64: 1, 8>}, {pipeline_mode = #tpu.pipeline_mode<synchronous>, transform_indices = @transform_2, window_bounds = array<i64: 1, 8>}]} {
    %c0_i32 = arith.constant 0 : i32
    %0 = arith.cmpi eq, %arg0, %c0_i32 : i32
    %1 = arith.extui %0 : i1 to i32
    %c0_i32_0 = arith.constant 0 : i32
    %2 = arith.cmpi ne, %1, %c0_i32_0 : i32
    scf.if %2 {
      %cst_11 = arith.constant 0.000000e+00 : f32
      %15 = vector.broadcast %cst_11 : f32 to vector<1x8xf32>
      %c0_12 = arith.constant 0 : index
      %c0_13 = arith.constant 0 : index
      %16 = vector.load %arg2[%c0_12, %c0_13] : memref<1x8xf32, #tpu.memory_space<vmem>>, vector<1x8xf32>
      tpu.vector_store %arg2[%c0_12, %c0_13], %15 {strides = array<i32>} : memref<1x8xf32, #tpu.memory_space<vmem>>, vector<1x8xf32>,
      %cst_14 = arith.constant 0.000000e+00 : f32
      %17 = vector.broadcast %cst_14 : f32 to vector<1x8xf32>
      %c0_15 = arith.constant 0 : index
      %c0_16 = arith.constant 0 : index
      %18 = vector.load %arg3[%c0_15, %c0_16] : memref<1x8xf32, #tpu.memory_space<vmem>>, vector<1x8xf32>
      tpu.vector_store %arg3[%c0_15, %c0_16], %17 {strides = array<i32>} : memref<1x8xf32, #tpu.memory_space<vmem>>, vector<1x8xf32>,
    } else {
    }
    %c0 = arith.constant 0 : index
    %c0_1 = arith.constant 0 : index
    %3 = vector.load %arg1[%c0, %c0_1] : memref<256x8xf32, #tpu.memory_space<vmem>>, vector<256x8xf32>
    %c0_2 = arith.constant 0 : index
    %c0_3 = arith.constant 0 : index
    %4 = vector.load %arg2[%c0_2, %c0_3] : memref<1x8xf32, #tpu.memory_space<vmem>>, vector<1x8xf32>
    %cst = arith.constant dense<0.000000e+00> : vector<8xf32>
    %5 = vector.multi_reduction <add>, %3, %cst [0] : vector<256x8xf32> to vector<8xf32>
    %6 = vector.shape_cast %5 : vector<8xf32> to vector<1x8xf32>
    %7 = arith.addf %4, %6 : vector<1x8xf32>
    %c0_4 = arith.constant 0 : index
    %c0_5 = arith.constant 0 : index
    %8 = vector.load %arg2[%c0_4, %c0_5] : memref<1x8xf32, #tpu.memory_space<vmem>>, vector<1x8xf32>
    tpu.vector_store %arg2[%c0_4, %c0_5], %7 {strides = array<i32>} : memref<1x8xf32, #tpu.memory_space<vmem>>, vector<1x8xf32>,
    %c0_6 = arith.constant 0 : index
    %c0_7 = arith.constant 0 : index
    %9 = vector.load %arg3[%c0_6, %c0_7] : memref<1x8xf32, #tpu.memory_space<vmem>>, vector<1x8xf32>
    %10 = arith.mulf %3, %3 : vector<256x8xf32>
    %cst_8 = arith.constant dense<0.000000e+00> : vector<8xf32>
    %11 = vector.multi_reduction <add>, %10, %cst_8 [0] : vector<256x8xf32> to vector<8xf32>
    %12 = vector.shape_cast %11 : vector<8xf32> to vector<1x8xf32>
    %13 = arith.addf %9, %12 : vector<1x8xf32>
    %c0_9 = arith.constant 0 : index
    %c0_10 = arith.constant 0 : index
    %14 = vector.load %arg3[%c0_9, %c0_10] : memref<1x8xf32, #tpu.memory_space<vmem>>, vector<1x8xf32>
    tpu.vector_store %arg3[%c0_9, %c0_10], %13 {strides = array<i32>} : memref<1x8xf32, #tpu.memory_space<vmem>>, vector<1x8xf32>,
    return
  }
  func.func @transform_0(%arg0: i32) -> (i32, i32) {
    %c0_i32 = arith.constant 0 : i32
    %c0_i32_0 = arith.constant 0 : i32
    return %arg0, %c0_i32 : i32, i32
  }
  func.func @transform_1(%arg0: i32) -> (i32, i32) {
    %c0_i32 = arith.constant 0 : i32
    %c0_i32_0 = arith.constant 0 : i32
    %c0_i32_1 = arith.constant 0 : i32
    return %c0_i32, %c0_i32_0 : i32, i32
  }
  func.func @transform_2(%arg0: i32) -> (i32, i32) {
    %c0_i32 = arith.constant 0 : i32
    %c0_i32_0 = arith.constant 0 : i32
    %c0_i32_1 = arith.constant 0 : i32
    return %c0_i32, %c0_i32_0 : i32, i32
  }
}

</mosaic_0001>

<bundles_post_ra>
// kernel: tpu_custom_call.1
= control target key start
LH: loop header
LB: loop body
LE: loop exit
PB: predicated region body
PF: predicated region fallthrough
CT: control target
= control target key end

     0   :  { %8 = vsyncpa [#allocation3], 0  ;;  %s701_s0 = inlined_call_operand.vmem [shape: f32[512,8], index: 0, kind: input, shape index: {}]   ;;  %s702_s1 = inlined_call_operand.hbm [shape: f32[1,8], index: 1, kind: output, shape index: {0}]   ;;  %s703_s2 = inlined_call_operand.hbm [shape: f32[1,8], index: 2, kind: output, shape index: {1}]  }
   0x1   :  { %9 = vsyncpa [#allocation5], 0  ;;  %s538_s9 = smov 0  }
   0x2 LB: > { %s544_s10 = sadd.s32 4294967295, %s518_s9   ;;  %p419_p0 = scmp.ge.s32.totalorder %s518_s9, 1  ;;  %s518_s9 = sphi %s538_s9, %s15_s9  }
   0x3   : > { %p108_p1 = scmp.lt.s32.totalorder %s518_s9, 3 }
   0x5   : > { %p109_p2 = pnand %p419_p0, %p108_p1 }
   0x6   : > { %s420_s11 = sshll.u32 (!%p109_p2), %s544_s10, 5  ;;  %p422_p4 = scmp.ne.s32.totalorder (!%p109_p2), %s544_s10, 0 }
   0x7   : > { %112 = sbr.rel (%p109_p2) target bundleno = 144 (0x90), region = 24  ;;  %p126_p3 = scmp.lt.s32.totalorder (!%p109_p2), %s420_s11, 63 }
   0xe   : > { %s705_s11 = smov (!%p126_p3, %s420_s11), 63  ;;  %134 = sbr.rel (%p422_p4) target bundleno = 21 (0x15), region = 28 }
   0xf   : > { %s421_s12 = sshll.u32 %s705_s11, 3  ;;  %vm135_vm0 = vcmask (!%p422_p4), 57344   ;;  %v520_v0 = vmov (!%p422_p4), 0.0  }
  0x10   : > { %s552_s15 = scalar_lea.vmem %s701_s0, %s421_s12  ;;  %136 = vst.msk [vmem:[#allocation2] sm:$0x1] (!%p422_p4), %vm135_vm0, %v520_v0  ;;  %137 = vst.msk [vmem:[#allocation4] sm:$0x1] (!%p422_p4), %vm135_vm0, %v520_v0 }
  0x15 PF: > { %v138_v1 = vld [vmem:[%s552_s15] sm:$0xff]  ;;  %v139_v2 = vld [vmem:[%s552_s15 + $0x8] sm:$0xff]  ;;  %v140_v3 = vld [vmem:[%s552_s15 + $0x10] sm:$0xff]  ;;  %vm171_vm1 = vcmask 64512   ;;  %s521_s16 = smov [#allocation2]   ;;  %vm242_vm2 = vcmask 57344  }
  0x16   : > { %v172_v4 = vsel %vm171_vm1, %v138_v1, 0.0  ;;  %v173_v5 = vsel %vm171_vm1, %v139_v2, 0.0  ;;  %v175_v6 = vsel %vm171_vm1, %v140_v3, 0.0  ;;  %v141_v7 = vld [vmem:[%s552_s15 + $0x18] sm:$0xff]  ;;  %v142_v10 = vld [vmem:[%s552_s15 + $0x20] sm:$0xff]  ;;  %v143_v13 = vld [vmem:[%s552_s15 + $0x28] sm:$0xff]  ;;  %v245_v28 = vmul.f32 %v138_v1, %v138_v1 }
  0x17   : > { %v174_v8 = vadd.f32 %v173_v5, %v172_v4  ;;  %v177_v9 = vsel %vm171_vm1, %v141_v7, 0.0  ;;  %v179_v12 = vsel %vm171_vm1, %v142_v10, 0.0  ;;  %v181_v15 = vsel %vm171_vm1, %v143_v13, 0.0  ;;  %v144_v16 = vld [vmem:[%s552_s15 + $0x30] sm:$0xff]  ;;  %v145_v19 = vld [vmem:[%s552_s15 + $0x38] sm:$0xff]  ;;  %v146_v22 = vld [vmem:[%s552_s15 + $0x40] sm:$0xff] }
  0x18   : > { %v183_v18 = vsel %vm171_vm1, %v144_v16, 0.0  ;;  %v185_v21 = vsel %vm171_vm1, %v145_v19, 0.0  ;;  %v187_v24 = vsel %vm171_vm1, %v146_v22, 0.0  ;;  %v147_v25 = vld [vmem:[%s552_s15 + $0x48] sm:$0xff]  ;;  %v246_v29 = vmul.f32 %v139_v2, %v139_v2  ;;  %v148_v31 = vld [vmem:[%s552_s15 + $0x50] sm:$0xff]  ;;  %v149_v33 = vld [vmem:[%s552_s15 + $0x58] sm:$0xff] }
  0x19   : > { %v176_v11 = vadd.f32 %v175_v6, %v174_v8  ;;  %v189_v27 = vsel %vm171_vm1, %v147_v25, 0.0  ;;  %v247_v30 = vmul.f32 %v140_v3, %v140_v3  ;;  %v191_v34 = vsel %vm171_vm1, %v148_v31, 0.0  ;;  %v150_v42 = vld [vmem:[%s552_s15 + $0x60] sm:$0xff]  ;;  %v151_v48 = vld [vmem:[%s552_s15 + $0x68] sm:$0xff]  ;;  %v152_v54 = vld [vmem:[%s552_s15 + $0x70] sm:$0xff]  ;;  %s355_s17 = sshll.u32 %s521_s16, 4  ;;  %s356_s17 = int_to_ptr.vmem [resolvable:$true] %s355_s17 }
  0x1a   : > { %v248_v35 = vmul.f32 %v141_v7, %v141_v7  ;;  %v193_v37 = vsel %vm171_vm1, %v149_v33, 0.0  ;;  %v249_v38 = vmul.f32 %v142_v10, %v142_v10  ;;  %v277_v39 = vsel %vm171_vm1, %v245_v28, 0.0  ;;  %v153_v60 = vld [vmem:[%s552_s15 + $0x78] sm:$0xff]  ;;  %v154_v2 = vld [vmem:[%s552_s15 + $0x80] sm:$0xff]  ;;  %v155_v8 = vld [vmem:[%s552_s15 + $0x88] sm:$0xff]  ;;  %p437_p5 = scmp.eq.s32.totalorder %s544_s10, 1  ;;  %p459_p9 = scmp.lt.s32.totalorder %s356_s17, %s356_s17 }
  0x1b   : > { %v178_v14 = vadd.f32 %v177_v9, %v176_v11  ;;  %v278_v40 = vsel %vm171_vm1, %v246_v29, 0.0  ;;  %v280_v41 = vsel %vm171_vm1, %v247_v30, 0.0  ;;  %v195_v45 = vsel %vm171_vm1, %v150_v42, 0.0  ;;  %s452_s18 = scalar_lea.vmem %s356_s17, 16  ;;  %s458_s19 = scalar_lea.vmem %s356_s17, 32 }
  0x1c   : > { %v279_v44 = vadd.f32 %v278_v40, %v277_v39  ;;  %v250_v46 = vmul.f32 %v143_v13, %v143_v13  ;;  %v282_v47 = vsel %vm171_vm1, %v248_v35, 0.0  ;;  %v197_v51 = vsel %vm171_vm1, %v151_v48, 0.0  ;;  %p453_p6 = scmp.ne.s32.totalorder %s356_s17, %s452_s18  ;;  %p460_p10 = scmp.lt.s32.totalorder %s458_s19, %s452_s18 }
  0x1d   : > { %v180_v17 = vadd.f32 %v179_v12, %v178_v14  ;;  %v251_v52 = vmul.f32 %v144_v16, %v144_v16  ;;  %v284_v53 = vsel %vm171_vm1, %v249_v38, 0.0  ;;  %v199_v57 = vsel %vm171_vm1, %v152_v54, 0.0  ;;  %v156_v14 = vld [vmem:[%s552_s15 + $0x90] sm:$0xff] }
  0x1e   : > { %v281_v50 = vadd.f32 %v280_v41, %v279_v44  ;;  %v252_v58 = vmul.f32 %v145_v19, %v145_v19  ;;  %v286_v59 = vsel %vm171_vm1, %v250_v46, 0.0  ;;  %v201_v63 = vsel %vm171_vm1, %v153_v60, 0.0  ;;  %v160_v38 = vld [vmem:[%s552_s15 + $0xb0] sm:$0xff]  ;;  %v161_v44 = vld [vmem:[%s552_s15 + $0xb8] sm:$0xff]  ;;  %p454_p7 = pnand %p453_p6, %p437_p5  ;;  %p461_p11 = por %p460_p10, %p459_p9 }
  0x1f   : > { %v182_v20 = vadd.f32 %v181_v15, %v180_v17  ;;  %v253_v0 = vmul.f32 %v146_v22, %v146_v22  ;;  %v288_v1 = vsel %vm171_vm1, %v251_v52, 0.0  ;;  %v203_v5 = vsel %vm171_vm1, %v154_v2, 0.0 }
  0x20   : > { %v283_v56 = vadd.f32 %v282_v47, %v281_v50  ;;  %v254_v6 = vmul.f32 %v147_v25, %v147_v25  ;;  %v290_v7 = vsel %vm171_vm1, %v252_v58, 0.0  ;;  %v205_v11 = vsel %vm171_vm1, %v155_v8, 0.0  ;;  %v162_v50 = vld [vmem:[%s552_s15 + $0xc0] sm:$0xff]  ;;  %p455_p8 = pneg %p454_p7 }
  0x21   : > { %v184_v23 = vadd.f32 %v183_v18, %v182_v20  ;;  %v255_v12 = vmul.f32 %v148_v31, %v148_v31  ;;  %v292_v13 = vsel %vm171_vm1, %v253_v0, 0.0  ;;  %v207_v17 = vsel %vm171_vm1, %v156_v14, 0.0  ;;  %v157_v20 = vld [vmem:[%s552_s15 + $0x98] sm:$0xff] }
  0x22   : > { %v285_v62 = vadd.f32 %v284_v53, %v283_v56  ;;  %v256_v18 = vmul.f32 %v149_v33, %v149_v33  ;;  %v294_v19 = vsel %vm171_vm1, %v254_v6, 0.0  ;;  %v258_v30 = vmul.f32 %v151_v48, %v151_v48  ;;  %v163_v56 = vld [vmem:[%s552_s15 + $0xc8] sm:$0xff]  ;;  %p462_p12 = pnand %p461_p11, %p455_p8 }
  0x23   : > { %v186_v26 = vadd.f32 %v185_v21, %v184_v23  ;;  %v209_v23 = vsel %vm171_vm1, %v157_v20, 0.0  ;;  %v296_v25 = vsel %vm171_vm1, %v255_v12, 0.0  ;;  %v215_v41 = vsel %vm171_vm1, %v160_v38, 0.0 }
  0x24   : > { %v287_v4 = vadd.f32 %v286_v59, %v285_v62  ;;  %v298_v31 = vsel %vm171_vm1, %v256_v18, 0.0  ;;  %v217_v47 = vsel %vm171_vm1, %v161_v44, 0.0  ;;  %v261_v48 = vmul.f32 %v154_v2, %v154_v2  ;;  %v164_v62 = vld [vmem:[%s552_s15 + $0xd0] sm:$0xff] }
  0x25   : > { %v188_v32 = vadd.f32 %v187_v24, %v186_v26  ;;  %v257_v24 = vmul.f32 %v150_v42, %v150_v42  ;;  %v158_v26 = vld [vmem:[%s552_s15 + $0xa0] sm:$0xff]  ;;  %v260_v42 = vmul.f32 %v153_v60, %v153_v60  ;;  %v219_v53 = vsel %vm171_vm1, %v162_v50, 0.0 }
  0x26   : > { %v289_v10 = vadd.f32 %v288_v1, %v287_v4  ;;  %v211_v29 = vsel %vm171_vm1, %v158_v26, 0.0  ;;  %v221_v59 = vsel %vm171_vm1, %v163_v56, 0.0  ;;  %v263_v60 = vmul.f32 %v156_v14, %v156_v14  ;;  %v165_v4 = vld [vmem:[%s552_s15 + $0xd8] sm:$0xff] }
  0x27   : > { %v190_v36 = vadd.f32 %v189_v27, %v188_v32  ;;  %v159_v32 = vld [vmem:[%s552_s15 + $0xa8] sm:$0xff]  ;;  %v223_v1 = vsel %vm171_vm1, %v164_v62, 0.0  ;;  %v264_v2 = vmul.f32 %v157_v20, %v157_v20  ;;  %v267_v20 = vmul.f32 %v160_v38, %v160_v38 }
  0x28   : > { %v291_v16 = vadd.f32 %v290_v7, %v289_v10  ;;  %v213_v35 = vsel %vm171_vm1, %v159_v32, 0.0  ;;  %v225_v7 = vsel %vm171_vm1, %v165_v4, 0.0  ;;  %v166_v10 = vld [vmem:[%s552_s15 + $0xe0] sm:$0xff]  ;;  %v266_v14 = vmul.f32 %v159_v32, %v159_v32 }
  0x29   : > { %v192_v43 = vadd.f32 %v191_v34, %v190_v36  ;;  %v259_v36 = vmul.f32 %v152_v54, %v152_v54  ;;  %v262_v54 = vmul.f32 %v155_v8, %v155_v8  ;;  %v265_v8 = vmul.f32 %v158_v26, %v158_v26 }
  0x2a   : > { %v293_v22 = vadd.f32 %v292_v13, %v291_v16  ;;  %v227_v13 = vsel %vm171_vm1, %v166_v10, 0.0  ;;  %v167_v16 = vld [vmem:[%s552_s15 + $0xe8] sm:$0xff]  ;;  %v268_v26 = vmul.f32 %v161_v44, %v161_v44  ;;  %v269_v32 = vmul.f32 %v162_v50, %v162_v50 }
  0x2b   : > { %v194_v49 = vadd.f32 %v193_v37, %v192_v43  ;;  %v300_v37 = vsel %vm171_vm1, %v257_v24, 0.0  ;;  %v302_v43 = vsel %vm171_vm1, %v258_v30, 0.0  ;;  %v272_v44 = vmul.f32 %v165_v4, %v165_v4 }
  0x2c   : > { %v295_v28 = vadd.f32 %v294_v19, %v293_v22  ;;  %v229_v19 = vsel %vm171_vm1, %v167_v16, 0.0  ;;  %v168_v22 = vld [vmem:[%s552_s15 + $0xf0] sm:$0xff] }
  0x2d   : > { %v196_v55 = vadd.f32 %v195_v45, %v194_v49  ;;  %v304_v49 = vsel %vm171_vm1, %v259_v36, 0.0  ;;  %v270_v36 = vmul.f32 %v163_v56, %v163_v56  ;;  %v275_v56 = vmul.f32 %v168_v22, %v168_v22 }
  0x2e   : > { %v297_v34 = vadd.f32 %v296_v25, %v295_v28  ;;  %v231_v25 = vsel %vm171_vm1, %v168_v22, 0.0  ;;  %v169_v28 = vld [vmem:[%s552_s15 + $0xf8] sm:$0xff] }
  0x2f   : > { %v198_v61 = vadd.f32 %v197_v51, %v196_v55  ;;  %v306_v55 = vsel %vm171_vm1, %v260_v42, 0.0 }
  0x30   : > { %v299_v40 = vadd.f32 %v298_v31, %v297_v34  ;;  %v233_v31 = vsel %vm171_vm1, %v169_v28, 0.0 }
  0x31   : > { %v200_v3 = vadd.f32 %v199_v57, %v198_v61  ;;  %v308_v61 = vsel %vm171_vm1, %v261_v48, 0.0  ;;  %v273_v48 = vmul.f32 %v166_v10, %v166_v10 }
  0x32   : > { %v301_v46 = vadd.f32 %v300_v37, %v299_v40  ;;  %v322_v37 = vsel %vm171_vm1, %v268_v26, 0.0  ;;  %v271_v40 = vmul.f32 %v164_v62, %v164_v62 }
  0x33   : > { %v202_v9 = vadd.f32 %v201_v63, %v200_v3  ;;  %v310_v3 = vsel %vm171_vm1, %v262_v54, 0.0 }
  0x34   : > { %v303_v52 = vadd.f32 %v302_v43, %v301_v46 }
  0x35   : > { %v204_v15 = vadd.f32 %v203_v5, %v202_v9  ;;  %v312_v9 = vsel %vm171_vm1, %v263_v60, 0.0  ;;  %v170_v60 = vld [vmem:[#allocation2] sm:$0x1] }
  0x36   : > { %v305_v58 = vadd.f32 %v304_v49, %v303_v52  ;;  %v328_v49 = vsel %vm171_vm1, %v271_v40, 0.0  ;;  %v274_v52 = vmul.f32 %v167_v16, %v167_v16 }
  0x37   : > { %v206_v21 = vadd.f32 %v205_v11, %v204_v15  ;;  %v314_v15 = vsel %vm171_vm1, %v264_v2, 0.0 }
  0x38   : > { %v307_v0 = vadd.f32 %v306_v55, %v305_v58  ;;  %v334_v62 = vsel %vm171_vm1, %v274_v52, 0.0 }
  0x39   : > { %v208_v27 = vadd.f32 %v207_v17, %v206_v21  ;;  %v316_v21 = vsel %vm171_vm1, %v265_v8, 0.0 }
  0x3a   : > { %v309_v6 = vadd.f32 %v308_v61, %v307_v0  ;;  %v276_v61 = vmul.f32 %v169_v28, %v169_v28 }
  0x3b   : > { %v210_v33 = vadd.f32 %v209_v23, %v208_v27  ;;  %v318_v27 = vsel %vm171_vm1, %v266_v14, 0.0 }
  0x3c   : > { %v311_v12 = vadd.f32 %v310_v3, %v309_v6  ;;  %v338_v4 = vsel %vm171_vm1, %v276_v61, 0.0 }
  0x3d   : > { %v212_v39 = vadd.f32 %v211_v29, %v210_v33  ;;  %v320_v33 = vsel %vm171_vm1, %v267_v20, 0.0 }
  0x3e   : > { %v313_v18 = vadd.f32 %v312_v9, %v311_v12 }
  0x3f   : > { %v214_v45 = vadd.f32 %v213_v35, %v212_v39 }
  0x40   : > { %v315_v24 = vadd.f32 %v314_v15, %v313_v18 }
  0x41   : > { %v216_v51 = vadd.f32 %v215_v41, %v214_v45  ;;  %v324_v41 = vsel %vm171_vm1, %v269_v32, 0.0  ;;  %v326_v45 = vsel %vm171_vm1, %v270_v36, 0.0 }
  0x42   : > { %v317_v30 = vadd.f32 %v316_v21, %v315_v24 }
  0x43   : > { %v218_v57 = vadd.f32 %v217_v47, %v216_v51 }
  0x44   : > { %v319_v35 = vadd.f32 %v318_v27, %v317_v30 }
  0x45   : > { %v220_v63 = vadd.f32 %v219_v53, %v218_v57  ;;  %v330_v53 = vsel %vm171_vm1, %v272_v44, 0.0  ;;  %v332_v57 = vsel %vm171_vm1, %v273_v48, 0.0 }
  0x46   : > { %v321_v39 = vadd.f32 %v320_v33, %v319_v35 }
  0x47   : > { %v222_v5 = vadd.f32 %v221_v59, %v220_v63 }
  0x48   : > { %v323_v43 = vadd.f32 %v322_v37, %v321_v39 }
  0x49   : > { %v224_v11 = vadd.f32 %v223_v1, %v222_v5  ;;  %v336_v1 = vsel %vm171_vm1, %v275_v56, 0.0 }
  0x4a   : > { %v325_v47 = vadd.f32 %v324_v41, %v323_v43 }
  0x4b   : > { %v226_v17 = vadd.f32 %v225_v7, %v224_v11 }
  0x4c   : > { %v327_v51 = vadd.f32 %v326_v45, %v325_v47 }
  0x4d   : > { %v228_v23 = vadd.f32 %v227_v13, %v226_v17 }
  0x4e   : > { %v329_v55 = vadd.f32 %v328_v49, %v327_v51 }
  0x4f   : > { %v230_v29 = vadd.f32 %v229_v19, %v228_v23 }
  0x50   : > { %v331_v59 = vadd.f32 %v330_v53, %v329_v55 }
  0x51   : > { %v232_v34 = vadd.f32 %v231_v25, %v230_v29 }
  0x52   : > { %v333_v0 = vadd.f32 %v332_v57, %v331_v59 }
  0x53   : > { %v234_v38 = vadd.f32 %v233_v31, %v232_v34 }
  0x54   : > { %v335_v3 = vadd.f32 %v334_v62, %v333_v0 }
  0x55   : > { %v235_v42 = vrot.slane %v234_v38, 4 }
  0x56   : > { %v337_v5 = vadd.f32 %v336_v1, %v335_v3 }
  0x57   : > { %v236_v46 = vadd.f32 %v235_v42, %v234_v38 }
  0x59   : > { %v237_v50 = vrot.slane %v236_v46, 2 }
  0x5b   : > { %v238_v54 = vadd.f32 %v237_v50, %v236_v46 }
  0x5d   : > { %v239_v58 = vrot.slane %v238_v54, 1 }
  0x5f   : > { %v240_v63 = vadd.f32 %v239_v58, %v238_v54 }
  0x61   : > { %v241_v2 = vadd.f32 %v240_v63, %v170_v60 }
  0x63   : > { %243 = vst.msk [vmem:[#allocation2] sm:$0x1] %vm242_vm2, %v241_v2 }
  0x64   : > { %465 = shalt.err (!%p462_p12)
}
  0x65   : > { %s466_s22 = scalar_lea.hbm %s702_s1, 16 }
  0x66   : > { %p467_p13 = scmp.ne.s32.totalorder %s702_s1, %s466_s22  ;;  %p472_p2 = scmp.lt.u32.totalorder %s466_s22, %s702_s1 }
  0x68   : > { %p468_p0 = pnand %p467_p13, %p437_p5 }
  0x6a   : > { %p469_p1 = pneg %p468_p0 }
  0x6c   : > { %p474_p3 = pnand %p472_p2, %p469_p1 }
  0x6e   : > { %477 = shalt.err (!%p474_p3)
}
  0x6f   : > { %430 = dma.vmem_to_hbm [thread:$0]  (%p437_p5), %s356_s17, 16, %s702_s1, [#allocation3]   ;;  %v339_v6 = vadd.f32 %v338_v4, %v337_v5  ;;  %v244_v12 = vld [vmem:[#allocation4] sm:$0x1] }
  0x70   : > { %s522_s29 = smov [#allocation4]  }
  0x71   : > { %v340_v7 = vrot.slane %v339_v6, 4  ;;  %s366_s30 = sshll.u32 %s522_s29, 4  ;;  %s367_s30 = int_to_ptr.vmem [resolvable:$true] %s366_s30 }
  0x72   : > { %s478_s3 = scalar_lea.vmem %s367_s30, 16  ;;  %s484_s4 = scalar_lea.vmem %s367_s30, 32 }
  0x73   : > { %v341_v8 = vadd.f32 %v340_v7, %v339_v6  ;;  %p479_p4 = scmp.ne.s32.totalorder %s367_s30, %s478_s3  ;;  %p485_p8 = scmp.lt.s32.totalorder %s367_s30, %s367_s30 }
  0x74   : > { %p486_p9 = scmp.lt.s32.totalorder %s484_s4, %s478_s3 }
  0x75   : > { %v342_v9 = vrot.slane %v341_v8, 2  ;;  %p480_p6 = pnand %p479_p4, %p437_p5 }
  0x76   : > { %p487_p10 = por %p486_p9, %p485_p8 }
  0x77   : > { %v343_v10 = vadd.f32 %v342_v9, %v341_v8  ;;  %p481_p7 = pneg %p480_p6 }
  0x79   : > { %v344_v11 = vrot.slane %v343_v10, 1  ;;  %p488_p11 = pnand %p487_p10, %p481_p7 }
  0x7b   : > { %v345_v13 = vadd.f32 %v344_v11, %v343_v10 }
  0x7d   : > { %v346_v14 = vadd.f32 %v345_v13, %v244_v12 }
  0x7f   : > { %347 = vst.msk [vmem:[#allocation4] sm:$0x1] %vm242_vm2, %v346_v14 }
  0x80   : > { %491 = shalt.err (!%p488_p11)
}
  0x81   : > { %s492_s7 = scalar_lea.hbm %s703_s2, 16 }
  0x82   : > { %p493_p12 = scmp.ne.s32.totalorder %s703_s2, %s492_s7  ;;  %p498_p1 = scmp.lt.u32.totalorder %s492_s7, %s703_s2 }
  0x84   : > { %p494_p13 = pnand %p493_p12, %p437_p5 }
  0x86   : > { %p495_p0 = pneg %p494_p13 }
  0x88   : > { %p500_p2 = pnand %p498_p1, %p495_p0 }
  0x8a   : > { %503 = shalt.err (!%p500_p2)
}
  0x8b   : > { %432 = dma.vmem_to_hbm [thread:$0]  (%p437_p5), %s367_s30, 16, %s703_s2, [#allocation5]  }
  0x8c   : > { %509 = dma.done.wait (%p437_p5), [#allocation3], 16  }
  0x8d   : > { %511 = vsyncadd (%p437_p5), [#allocation3], 4294967280 }
  0x8e   : > { %513 = dma.done.wait (%p437_p5), [#allocation5], 16  }
  0x8f   : > { %515 = vsyncadd (%p437_p5), [#allocation5], 4294967280 }
  0x90 PF: > { %s15_s9 = sadd.s32 1, %s518_s9  }
  0x91   : > { %p12_p3 = scmp.ge.s32.totalorder %s15_s9, 4  }
  0x93   :  { %14 = sbr.rel (!%p12_p3) target bundleno = 2 (0x2), region = 63 }
  0x9a   :  { %383 = vsyncpa [#allocation3], 1 }
  0x9b   :  { %385 = vsyncpa [#allocation3 + $0x1], 1 }
  0x9c   :  { %386 = vsyncpa [#allocation5], 1 }

</bundles_post_ra>
